<compile_context>
chip_gen: v6e
topology: v6e:2x2x1
jax: 0.10.0
libtpu: 0.0.40
codegen_flags: <defaults>
</compile_context>

<pallas_src>
import jax
import jax.numpy as jnp
from jax.experimental import pallas as pl
from jax.experimental.pallas import tpu as pltpu


# ----------------------------------------------------------------------------
# Pallas kernel: pointwise MLP (SA module) + mean-over-points (z), G sub-clouds
# per grid step, two consecutive points packed per row (lane-dense layout).
# ----------------------------------------------------------------------------
def _sa_encoder_kernel(x_ref, w1_ref, b1_ref, w2_ref, b2_ref, feat_ref, z_ref):
    # x block: (G*N/2, 2*Cin) -- row r holds the coords of points 2r and 2r+1.
    x = x_ref[...]
    # layer 1: 1x1 conv == matmul over channels (block-diag weights keep the
    # two packed points independent), then ReLU.
    h = jnp.dot(x, w1_ref[...], preferred_element_type=jnp.float32) + b1_ref[...]
    h = jnp.maximum(h, 0.0)
    # layer 2
    f = jnp.dot(h, w2_ref[...], preferred_element_type=jnp.float32) + b2_ref[...]
    f = jnp.maximum(f, 0.0)                       # (G*N/2, 2*C2) f32, lane-dense
    # bf16 store halves the dominant HBM writeback; math stays f32.
    feat_ref[...] = f.astype(feat_ref.dtype)

    # z = features.mean(dim=2) in the PyTorch (B, C, N) convention
    #   == mean over the points of each sub-cloud of this block.
    # Tile-aligned reshape (N/2 rows per group, N/2 % 8 == 0) + cross-sublane
    # sum on the XLU -- no pool matrix, no iotas, no integer divide.
    g, c2 = z_ref.shape
    m, two_c2 = f.shape
    n_half = m // g                               # N/2 packed rows per sub-cloud
    s = jnp.sum(f.reshape(g, n_half, two_c2), axis=1)          # (G, 2*C2)
    # fold the two packed halves back together and normalize.
    z_ref[...] = ((s[:, :c2] + s[:, c2:]) * (1.0 / (2 * n_half))).astype(z_ref.dtype)


def _block_diag2(w):
    """[[w, 0], [0, w]] -- keeps the two packed points independent."""
    z = jnp.zeros_like(w)
    top = jnp.concatenate([w, z], axis=1)
    bot = jnp.concatenate([z, w], axis=1)
    return jnp.concatenate([top, bot], axis=0)


def _vmem_capacity_bytes(default=64 << 20):
    """Physical VMEM of the current generation; conservative 64 MiB fallback."""
    try:
        cap = getattr(pltpu.get_tpu_info(), "vmem_capacity_bytes", None)
        if cap:
            return int(cap)
    except Exception:
        pass
    return default


def _block_bytes(g, n_half, feat_bytes):
    """Pipeline VMEM footprint for one grid step (double-buffered).

    The 6-wide input block is lane-padded to 128 lanes in VMEM, so it costs
    the same per row as the 128-wide feature block (not 24 B/row)."""
    rows = g * n_half
    x_b = rows * 128 * 4            # f32 input block, lane-padded
    f_b = rows * 128 * feat_bytes   # feature block (bf16 -> 2 B)
    z_b = g * 128 * 4               # z block, lane-padded
    w_b = 1 << 17                   # weights + biases, generous
    return 2 * (x_b + f_b + z_b) + w_b


def _choose_group_size(b_sub, n_half, feat_bytes, vmem_budget, want_steps=8):
    """Largest G (sub-clouds per step) that (a) satisfies the (8,128) block
    rules, (b) fits the per-generation VMEM budget, and (c) leaves enough grid
    steps (>= 8 when B_sub allows) for the pipeline to hide DMA and feed both
    v7x TensorCores."""
    def legal(g):
        return b_sub % g == 0 and (g % 8 == 0 or g == b_sub)

    cands = sorted(g for g in range(1, b_sub + 1) if legal(g))
    if not cands:
        return b_sub
    fitting = [g for g in cands if _block_bytes(g, n_half, feat_bytes) <= vmem_budget]
    if not fitting:
        fitting = [cands[0]]
    for steps_goal in (want_steps, 4, 2, 1):
        ok = [g for g in fitting if b_sub // g >= steps_goal]
        if ok:
            return max(ok)
    return max(fitting)


def sa_encode(x, w1, b1, w2, b2, *, group_size=None, feat_dtype=jnp.bfloat16):
    """x: (B_sub, N, Cin) f32 -> (features (B_sub, N, C_out) NWC feat_dtype,
                                  z (B_sub, C_out) f32)."""
    B_sub, N, Cin = x.shape
    C1 = w1.shape[1]
    C2 = w2.shape[1]
    assert w1.shape == (Cin, C1) and w2.shape == (C1, C2)
    assert b1.shape == (1, C1) and b2.shape == (1, C2)
    assert N % 2 == 0, "point-pair lane packing needs an even number of points"
    # TODO(synk): general N would need a padded tail block; the in-kernel
    # reshape-sum requires N/2 to be a multiple of 8 (tile-aligned split).
    assert (N // 2) % 8 == 0, "in-kernel reshape-sum needs (N/2) % 8 == 0"

    feat_bytes = jnp.dtype(feat_dtype).itemsize
    vmem_cap = _vmem_capacity_bytes()
    vmem_budget = vmem_cap // 8        # ~8 MiB on v7x, ~16 MiB on v5e/v6e

    G = group_size or _choose_group_size(B_sub, N // 2, feat_bytes, vmem_budget)
    # Respect the (8,128) block rule even for a user-supplied group_size.
    if B_sub % G != 0 or (G % 8 != 0 and G != B_sub):
        G = B_sub
    steps = B_sub // G
    rows_per_block = G * N // 2

    # Explicit scoped-VMEM limit derived from the actual block sizes (defaults
    # are 16 MiB on v5e / 32 MiB on v6e,v7x and can silently spill).
    blk = _block_bytes(G, N // 2, feat_bytes)
    vmem_limit = int(min(max(2 * blk, 16 << 20), max(vmem_cap - (8 << 20), 16 << 20)))

    # Point-pair packing: fold two consecutive points into one row so every
    # matmul / HBM store has a 2*C-wide last dim (128 lanes for C2=64).
    # These reshapes are contiguous row-major regroupings -> free, no transpose.
    x_pairs = x.reshape(B_sub * N // 2, 2 * Cin)
    w1_bd, b1_bd = _block_diag2(w1), jnp.concatenate([b1, b1], axis=1)
    w2_bd, b2_bd = _block_diag2(w2), jnp.concatenate([b2, b2], axis=1)

    # Advisory cost estimate: long, memory-bound, no transcendentals.
    total_rows = B_sub * N // 2
    flops = 2 * total_rows * ((2 * Cin) * (2 * C1) + (2 * C1) * (2 * C2))
    bytes_accessed = (
        total_rows * 2 * Cin * 4                      # x read
        + total_rows * 2 * C2 * feat_bytes            # features write
        + B_sub * C2 * 4                              # z write
        + (2 * Cin * 2 * C1 + 2 * C1 * 2 * C2 + 2 * C1 + 2 * C2) * 4)  # weights
    cost = pl.CostEstimate(flops=flops, transcendentals=0,
                           bytes_accessed=bytes_accessed)

    feat_pairs, z = pl.pallas_call(
        _sa_encoder_kernel,
        out_shape=(
            jax.ShapeDtypeStruct((B_sub * N // 2, 2 * C2), feat_dtype),
            jax.ShapeDtypeStruct((B_sub, C2), jnp.float32),
        ),
        grid_spec=pltpu.PrefetchScalarGridSpec(
            num_scalar_prefetch=0,
            grid=(steps,),
            in_specs=[
                pl.BlockSpec((rows_per_block, 2 * Cin), lambda b: (b, 0)),
                pl.BlockSpec((2 * Cin, 2 * C1), lambda b: (0, 0)),
                pl.BlockSpec((1, 2 * C1), lambda b: (0, 0)),
                pl.BlockSpec((2 * C1, 2 * C2), lambda b: (0, 0)),
                pl.BlockSpec((1, 2 * C2), lambda b: (0, 0)),
            ],
            out_specs=[
                pl.BlockSpec((rows_per_block, 2 * C2), lambda b: (b, 0)),
                pl.BlockSpec((G, C2), lambda b: (b, 0)),
            ],
        ),
        compiler_params=pltpu.CompilerParams(
            dimension_semantics=("parallel",),
            vmem_limit_bytes=vmem_limit),
        cost_estimate=cost,
    )(x_pairs, w1_bd, b1_bd, w2_bd, b2_bd)

    # Un-pack the point pairs: contiguous reshape, free.
    features = feat_pairs.reshape(B_sub, N, C2)
    return features, z


# ----------------------------------------------------------------------------
# PointNetEncoder.forward (encoder_num == 0, calc_loss == True path), glue in JAX
# ----------------------------------------------------------------------------
def pointnet_encoder_forward(xyz, params, *, subcloud_cube_size, points_per_group):
    """xyz: (B, P, 3).  features input is None (encoder_num == 0)."""
    B, P, _ = xyz.shape
    cube = subcloud_cube_size
    n_groups = cube ** 3
    assert P == n_groups * points_per_group

    # _patchify: deterministic grouper -- split the cloud into cube^3 sub-clouds.
    sub_xyz = xyz.reshape(B * n_groups, points_per_group, 3)
    failed_groups = jnp.zeros((B * n_groups,), dtype=jnp.bool_)

    # SA_modules: synthetic pointwise-MLP set abstraction (Pallas hot path).
    # xyz is unchanged (no subsampling in this synthetic SA module);
    # features start as None, so the MLP consumes the xyz coordinates.
    features, z = sa_encode(sub_xyz, params["w1"], params["b1"],
                            params["w2"], params["b2"])
    new_xyz = sub_xyz

    # z.reshape(-1, cube, cube, cube, C).permute(0, 4, 1, 2, 3)  (tiny tensor)
    C = z.shape[1]
    z_vol = z.reshape(B, cube, cube, cube, C).transpose(0, 4, 1, 2, 3)
    targets_to_ignore = failed_groups.reshape(B, cube, cube, cube)

    # TODO(synk): InfoNCE_Loss(z, z, targets_to_ignore) is an external module
    # (separate learned predictors + contrastive sampling); not translated.
    loss = None

    # NOTE: features are returned channels-LAST (B_sub, N, C) in bf16.  The
    # PyTorch NCW f32 layout would cost a full extra HBM read+write of the
    # largest tensor; downstream consumers should take NWC bf16 (or fuse the
    # transpose/cast themselves).
    return new_xyz, features, loss, failed_groups, z_vol, targets_to_ignore


if __name__ == "__main__":
    key = jax.random.PRNGKey(0)
    k_xyz, k_w1, k_b1, k_w2, k_b2 = jax.random.split(key, 5)

    # Small deterministic problem: batch=2, cube=2 -> 8 sub-clouds per cloud,
    # 32 points per sub-cloud, MLP 3 -> 32 -> 64 (feature_length = 64).
    B, cube, n_pts = 2, 2, 32
    P = (cube ** 3) * n_pts
    C_in, C_hid, C_out = 3, 32, 64

    xyz = jax.random.normal(k_xyz, (B, P, C_in), dtype=jnp.float32)
    params = {
        "w1": jax.random.normal(k_w1, (C_in, C_hid), dtype=jnp.float32) * 0.1,
        "b1": jax.random.normal(k_b1, (1, C_hid), dtype=jnp.float32) * 0.01,
        "w2": jax.random.normal(k_w2, (C_hid, C_out), dtype=jnp.float32) * 0.1,
        "b2": jax.random.normal(k_b2, (1, C_out), dtype=jnp.float32) * 0.01,
    }

    new_xyz, features, loss, failed_groups, z_vol, tgt_ignore = (
        pointnet_encoder_forward(xyz, params,
                                 subcloud_cube_size=cube,
                                 points_per_group=n_pts))
    jax.block_until_ready((new_xyz, features, z_vol, failed_groups))

    # Sanity: compare kernel against a plain-JAX reference of the same math.
    sub = xyz.reshape(B * cube ** 3, n_pts, C_in)
    ref_h = jnp.maximum(sub @ params["w1"] + params["b1"], 0.0)
    ref_f = jnp.maximum(ref_h @ params["w2"] + params["b2"], 0.0)
    ref_z = ref_f.mean(axis=1).reshape(B, cube, cube, cube, C_out)
    ref_z = ref_z.transpose(0, 4, 1, 2, 3)
    assert features.shape == (B * cube ** 3, n_pts, C_out)
    assert features.dtype == jnp.bfloat16
    assert z_vol.shape == (B, C_out, cube, cube, cube)
    # features are bf16-rounded at the store; compare with a bf16-level tolerance.
    assert jnp.allclose(features.astype(jnp.float32), ref_f, atol=2e-2, rtol=2e-2)
    # z is accumulated and stored in f32.
    assert jnp.allclose(z_vol, ref_z, atol=1e-3)

    print("KERNEL_OK")
</pallas_src>

<mosaic_0001>
module attributes {stable_mosaic.version = 11 : i64} {
  func.func @_sa_encoder_kernel(%arg0: i32, %arg1: memref<128x6xf32, #tpu.memory_space<vmem>>, %arg2: memref<6x64xf32, #tpu.memory_space<vmem>>, %arg3: memref<1x64xf32, #tpu.memory_space<vmem>>, %arg4: memref<64x128xf32, #tpu.memory_space<vmem>>, %arg5: memref<1x128xf32, #tpu.memory_space<vmem>>, %arg6: memref<128x128xbf16, #tpu.memory_space<vmem>>, %arg7: memref<8x64xf32, #tpu.memory_space<vmem>>) attributes {dimension_semantics = [#tpu.dimension_semantics<parallel>], iteration_bounds = array<i64: 2>, scalar_prefetch = 0 : i64, scratch_operands = 0 : i64, tpu.core_type = #tpu.core_type<tc>, window_params = [{transform_indices = @transform_0, window_bounds = array<i64: 128, 6>}, {pipeline_mode = #tpu.pipeline_mode<synchronous>, transform_indices = @transform_1, window_bounds = array<i64: 6, 64>}, {pipeline_mode = #tpu.pipeline_mode<synchronous>, transform_indices = @transform_2, window_bounds = array<i64: 1, 64>}, {pipeline_mode = #tpu.pipeline_mode<synchronous>, transform_indices = @transform_3, window_bounds = array<i64: 64, 128>}, {pipeline_mode = #tpu.pipeline_mode<synchronous>, transform_indices = @transform_4, window_bounds = array<i64: 1, 128>}, {transform_indices = @transform_5, window_bounds = array<i64: 128, 128>}, {transform_indices = @transform_6, window_bounds = array<i64: 8, 64>}]} {
    %c0 = arith.constant 0 : index
    %c0_0 = arith.constant 0 : index
    %0 = vector.load %arg1[%c0, %c0_0] : memref<128x6xf32, #tpu.memory_space<vmem>>, vector<128x6xf32>
    %c0_1 = arith.constant 0 : index
    %c0_2 = arith.constant 0 : index
    %1 = vector.load %arg2[%c0_1, %c0_2] : memref<6x64xf32, #tpu.memory_space<vmem>>, vector<6x64xf32>
    %cst = arith.constant dense<0.000000e+00> : vector<128x64xf32>
    %2 = tpu.matmul %0, %1, %cst {dimension_numbers = #tpu.dot_dimension_numbers<[1], [0], [0], [1], [0, 0, 1, 1], [], []>} : vector<128x6xf32>, vector<6x64xf32>, vector<128x64xf32> -> vector<128x64xf32>
    %c0_3 = arith.constant 0 : index
    %c0_4 = arith.constant 0 : index
    %3 = vector.load %arg3[%c0_3, %c0_4] : memref<1x64xf32, #tpu.memory_space<vmem>>, vector<1x64xf32>
    %4 = vector.broadcast %3 : vector<1x64xf32> to vector<128x64xf32>
    %5 = arith.addf %2, %4 : vector<128x64xf32>
    %cst_5 = arith.constant 0.000000e+00 : f32
    %6 = vector.broadcast %cst_5 : f32 to vector<128x64xf32>
    %7 = arith.maximumf %5, %6 : vector<128x64xf32>
    %c0_6 = arith.constant 0 : index
    %c0_7 = arith.constant 0 : index
    %8 = vector.load %arg4[%c0_6, %c0_7] : memref<64x128xf32, #tpu.memory_space<vmem>>, vector<64x128xf32>
    %cst_8 = arith.constant dense<0.000000e+00> : vector<128x128xf32>
    %9 = tpu.matmul %7, %8, %cst_8 {dimension_numbers = #tpu.dot_dimension_numbers<[1], [0], [0], [1], [0, 0, 1, 1], [], []>} : vector<128x64xf32>, vector<64x128xf32>, vector<128x128xf32> -> vector<128x128xf32>
    %c0_9 = arith.constant 0 : index
    %c0_10 = arith.constant 0 : index
    %10 = vector.load %arg5[%c0_9, %c0_10] : memref<1x128xf32, #tpu.memory_space<vmem>>, vector<1x128xf32>
    %11 = vector.broadcast %10 : vector<1x128xf32> to vector<128x128xf32>
    %12 = arith.addf %9, %11 : vector<128x128xf32>
    %cst_11 = arith.constant 0.000000e+00 : f32
    %13 = vector.broadcast %cst_11 : f32 to vector<128x128xf32>
    %14 = arith.maximumf %12, %13 : vector<128x128xf32>
    %15 = arith.truncf %14 : vector<128x128xf32> to vector<128x128xbf16>
    %c0_12 = arith.constant 0 : index
    %c0_13 = arith.constant 0 : index
    %16 = vector.load %arg6[%c0_12, %c0_13] : memref<128x128xbf16, #tpu.memory_space<vmem>>, vector<128x128xbf16>
    tpu.vector_store %arg6[%c0_12, %c0_13], %15 {strides = array<i32>} : memref<128x128xbf16, #tpu.memory_space<vmem>>, vector<128x128xbf16>,
    %17 = vector.shape_cast %14 : vector<128x128xf32> to vector<8x16x128xf32>
    %cst_14 = arith.constant dense<0.000000e+00> : vector<8x128xf32>
    %18 = vector.multi_reduction <add>, %17, %cst_14 [1] : vector<8x16x128xf32> to vector<8x128xf32>
    %19 = vector.extract_strided_slice %18 {offsets = [0, 0], sizes = [8, 64], strides = [1, 1]} : vector<8x128xf32> to vector<8x64xf32>
    %20 = vector.extract_strided_slice %18 {offsets = [0, 64], sizes = [8, 64], strides = [1, 1]} : vector<8x128xf32> to vector<8x64xf32>
    %21 = arith.addf %19, %20 : vector<8x64xf32>
    %cst_15 = arith.constant 3.125000e-02 : f32
    %22 = vector.broadcast %cst_15 : f32 to vector<8x64xf32>
    %23 = arith.mulf %21, %22 : vector<8x64xf32>
    %c0_16 = arith.constant 0 : index
    %c0_17 = arith.constant 0 : index
    %24 = vector.load %arg7[%c0_16, %c0_17] : memref<8x64xf32, #tpu.memory_space<vmem>>, vector<8x64xf32>
    tpu.vector_store %arg7[%c0_16, %c0_17], %23 {strides = array<i32>} : memref<8x64xf32, #tpu.memory_space<vmem>>, vector<8x64xf32>,
    return
  }
  func.func @transform_0(%arg0: i32) -> (i32, i32) {
    %c0_i32 = arith.constant 0 : i32
    %c0_i32_0 = arith.constant 0 : i32
    return %arg0, %c0_i32 : i32, i32
  }
  func.func @transform_1(%arg0: i32) -> (i32, i32) {
    %c0_i32 = arith.constant 0 : i32
    %c0_i32_0 = arith.constant 0 : i32
    %c0_i32_1 = arith.constant 0 : i32
    return %c0_i32, %c0_i32_0 : i32, i32
  }
  func.func @transform_2(%arg0: i32) -> (i32, i32) {
    %c0_i32 = arith.constant 0 : i32
    %c0_i32_0 = arith.constant 0 : i32
    %c0_i32_1 = arith.constant 0 : i32
    return %c0_i32, %c0_i32_0 : i32, i32
  }
  func.func @transform_3(%arg0: i32) -> (i32, i32) {
    %c0_i32 = arith.constant 0 : i32
    %c0_i32_0 = arith.constant 0 : i32
    %c0_i32_1 = arith.constant 0 : i32
    return %c0_i32, %c0_i32_0 : i32, i32
  }
  func.func @transform_4(%arg0: i32) -> (i32, i32) {
    %c0_i32 = arith.constant 0 : i32
    %c0_i32_0 = arith.constant 0 : i32
    %c0_i32_1 = arith.constant 0 : i32
    return %c0_i32, %c0_i32_0 : i32, i32
  }
  func.func @transform_5(%arg0: i32) -> (i32, i32) {
    %c0_i32 = arith.constant 0 : i32
    %c0_i32_0 = arith.constant 0 : i32
    return %arg0, %c0_i32 : i32, i32
  }
  func.func @transform_6(%arg0: i32) -> (i32, i32) {
    %c0_i32 = arith.constant 0 : i32
    %c0_i32_0 = arith.constant 0 : i32
    return %arg0, %c0_i32 : i32, i32
  }
}

</mosaic_0001>

<bundles_post_ra>
// kernel: tpu_custom_call.1
= control target key start
LH: loop header
LB: loop body
LE: loop exit
PB: predicated region body
PF: predicated region fallthrough
CT: control target
= control target key end

     0   :  { %12 = vsyncpa [#allocation3], 0  ;;  %s1765_s0 = inlined_call_operand.vmem [shape: f32[256,6], index: 0, kind: input, shape index: {}]   ;;  %s1766_s1 = inlined_call_operand.vmem [shape: f32[6,64], index: 1, kind: input, shape index: {}]   ;;  %s1767_s2 = inlined_call_operand.vmem [shape: f32[1,64], index: 2, kind: input, shape index: {}]   ;;  %s1768_s3 = inlined_call_operand.vmem [shape: f32[64,128], index: 3, kind: input, shape index: {}]   ;;  %s1769_s4 = inlined_call_operand.vmem [shape: f32[1,128], index: 4, kind: input, shape index: {}]   ;;  %s1770_s5 = inlined_call_operand.hbm [shape: bf16[256,128], index: 5, kind: output, shape index: {0}]   ;;  %s1771_s6 = inlined_call_operand.hbm [shape: f32[16,64], index: 6, kind: output, shape index: {1}]  }
   0x1   :  { %14 = vsyncpa [#allocation3 + $0x1], 0 }
   0x2   :  { %15 = vsyncpa [#allocation5], 0 }
   0x3   :  { %17 = vsyncpa [#allocation5 + $0x1], 0  ;;  %s1498_s21 = smov 0   ;;  %s1500_s22 = smov 0  }
   0x4   :  { %s1502_s23 = smov 0   ;;  %s1504_s24 = smov 0  }
   0x5 LB: > { %s1519_s25 = sadd.s32 4294967295, %s1457_s24   ;;  %s1068_s26 = sadd.s32 4294967294, %s1457_s24   ;;  %s1457_s24 = sphi %s1504_s24, %s1777_s24   ;;  %s1453_s23 = sphi %s1502_s23, %s1776_s23   ;;  %s1449_s22 = sphi %s1500_s22, %s1775_s22   ;;  %s1445_s21 = sphi %s1498_s21, %s1774_s21  }
   0x6   : > { %s1523_s27 = sadd.s32 1, %s1457_s24   ;;  %s140_s28 = sadd.s32 1, %s1453_s23 }
   0x7   : > { %s137_s29 = ssub.s32 %s1457_s24, %s1523_s27  ;;  %p150_p0 = scmp.ne.s32.totalorder %s1453_s23, %s1449_s22 }
   0x8   : > { %p138_p1 = scmp.eq.s32.totalorder %s137_s29, 0  ;;  %p151_p2 = scmp.eq.s32.totalorder %s1519_s25, 1 }
   0x9   : > { %p156_p3 = scmp.ne.s32.totalorder %s1449_s22, %s1445_s21  ;;  %p157_p4 = scmp.eq.s32.totalorder %s1068_s26, 1 }
   0xa   : > { %s1534_s30 = scalar_select %p138_p1, %s1453_s23, %s140_s28  }
   0xb   : > { %p1536_p5 = por %p151_p2, %p150_p0  ;;  %p1540_p6 = por %p157_p4, %p156_p3 }
   0xc   : > { %p1071_p7 = scmp.ge.s32.totalorder %s1457_s24, 1  ;;  %p222_p8 = scmp.lt.s32.totalorder %s1457_s24, 3 }
   0xe   : > { %p223_p9 = pnand %p1071_p7, %p222_p8 }
   0xf   : > { %s1074_s11 = sshll.u32 (!%p223_p9), %s1519_s25, 4  ;;  %s1459_s9 = smov (!%p223_p9), 64  }
  0x10   : > { %226 = sbr.rel (%p223_p9) target bundleno = 613 (0x265), region = 40  ;;  %p258_p10 = scmp.lt.s32.totalorder (!%p223_p9), %s1074_s11, 31 }
  0x11   : > { %s1150_s10 = sshll.u32 (!%p223_p9), %s1519_s25, 10  ;;  %s1460_s17 = smov (!%p223_p9), [#allocation2]  }
  0x12   : > { %s1687_s14 = scalar_lea.hbm (!%p223_p9), %s1770_s5, %s1150_s10 }
  0x15   : > { %v280_v0 = vld [vmem:[%s1766_s1] sm:$0x3f]  ;;  %vm337_vm0 = vcmask 1045504   ;;  %v509_v1 = vld [vmem:[%s1768_s3 + $0x38] sm:$0xff]  ;;  %v508_v2 = vld [vmem:[%s1768_s3 + $0x30] sm:$0xff]  ;;  %s1779_s11 = smov (!%p258_p10, %s1074_s11), 31 }
  0x16   : > { %1239 = vmatprep.subr.msk.mxu0 %vm337_vm0, %v280_v0  ;;  %1305 = vmatprep.subr.mxu1 %v509_v1  ;;  %v507_v3 = vld [vmem:[%s1768_s3 + $0x28] sm:$0xff]  ;;  %s1075_s18 = sshll.u32 %s1779_s11, 3  ;;  %vm288_vm1 = vcmask 48128   ;;  %v506_v4 = vld [vmem:[%s1768_s3 + $0x20] sm:$0xff]  ;;  %v505_v21 = vld [vmem:[%s1768_s3 + $0x18] sm:$0xff]  ;;  %vm517_vm2 = vcmask 523264  }
  0x17   : > { %1240 = vmatpush3.msk.msra.mxu0 %vm337_vm0, %v280_v0  ;;  %1313 = vmatpush3.msra.mxu1 %v509_v1  ;;  %s1562_s26 = scalar_lea.vmem %s1765_s0, %s1075_s18  ;;  %v504_v22 = vld [vmem:[%s1768_s3 + $0x10] sm:$0xff]  ;;  %v503_v23 = vld [vmem:[%s1768_s3 + $0x8] sm:$0xff]  ;;  %v502_v24 = vld [vmem:[%s1768_s3] sm:$0xff]  ;;  %s1371_s18 = sshll.u32 %s1460_s17, 4  ;;  %s1372_s18 = int_to_ptr.vmem [resolvable:$false] %s1371_s18 }
  0x18   : > { %1265 = vmatprep.subr.mxu0 %v509_v1  ;;  %1306 = vmatprep.subr.mxu1 %v508_v2  ;;  %v264_v5 = vld [vmem:[%s1562_s26] sm:$0xff]  ;;  %v265_v6 = vld [vmem:[%s1562_s26 + $0x8] sm:$0xff]  ;;  %v266_v7 = vld [vmem:[%s1562_s26 + $0x10] sm:$0xff]  ;;  %s1373_s19 = scalar_lea.vmem %s1372_s18, 2048 }
  0x19   : > { %1314 = vmatpush3.msra.mxu1 %v508_v2  ;;  %1241 = vmatprep.mubr.msk.f32.mxu0 %vm288_vm1, %v264_v5  ;;  %v267_v8 = vld [vmem:[%s1562_s26 + $0x18] sm:$0xff]  ;;  %v268_v9 = vld [vmem:[%s1562_s26 + $0x20] sm:$0xff]  ;;  %v269_v10 = vld [vmem:[%s1562_s26 + $0x28] sm:$0xff] }
  0x1a   : > { %1307 = vmatprep.subr.mxu1 %v507_v3  ;;  %1242 = vmatmul.mubr.msk.f32.vlgmr.msra.gmra.mxu0 %vm288_vm1, %v265_v6  ;;  %v270_v11 = vld [vmem:[%s1562_s26 + $0x30] sm:$0xff]  ;;  %v271_v12 = vld [vmem:[%s1562_s26 + $0x38] sm:$0xff]  ;;  %v272_v13 = vld [vmem:[%s1562_s26 + $0x40] sm:$0xff] }
  0x1b   : > { %1315 = vmatpush3.msra.mxu1 %v507_v3  ;;  %1244 = vmatprep.mubr.msk.f32.mxu0 %vm288_vm1, %v266_v7  ;;  %v273_v14 = vld [vmem:[%s1562_s26 + $0x48] sm:$0xff]  ;;  %v274_v15 = vld [vmem:[%s1562_s26 + $0x50] sm:$0xff]  ;;  %v275_v16 = vld [vmem:[%s1562_s26 + $0x58] sm:$0xff] }
  0x1c   : > { %1308 = vmatprep.subr.mxu1 %v506_v4  ;;  %1266 = vmatpush3.msra.mxu0 %v509_v1  ;;  %v276_v17 = vld [vmem:[%s1562_s26 + $0x60] sm:$0xff]  ;;  %v277_v18 = vld [vmem:[%s1562_s26 + $0x68] sm:$0xff]  ;;  %v278_v19 = vld [vmem:[%s1562_s26 + $0x70] sm:$0xff] }
  0x1d   : > { %1316 = vmatpush3.msra.mxu1 %v506_v4  ;;  %1267 = vmatprep.subr.mxu0 %v508_v2  ;;  %v279_v20 = vld [vmem:[%s1562_s26 + $0x78] sm:$0xff]  ;;  %v1076_v25 = vld [vmem:[%s1767_s2] ss:$0 sm:$0xff]  ;;  %s1636_s26 = sand.u32 1, %s1449_s22  }
  0x1e   : > { %1268 = vmatpush3.msra.mxu0 %v508_v2  ;;  %1309 = vmatprep.subr.mxu1 %v505_v21  ;;  %s1072_s28 = sshll.u32 %s1636_s26, 6  ;;  %s943_s15 = scalar_lea.sflag [#allocation3], %s1636_s26 }
  0x1f   : > { %1245 = vmatmul.mubr.msk.f32.gmra.mxu0 %vm288_vm1, %v267_v8  ;;  %1269 = vmatprep.subr.mxu0 %v507_v3  ;;  %s1643_s29 = scalar_lea.vmem [#allocation2], %s1072_s28 }
  0x20   : > { %1247 = vmatprep.mubr.msk.f32.mxu0 %vm288_vm1, %v268_v9  ;;  %1270 = vmatpush3.msra.mxu0 %v507_v3  ;;  %s961_s11 = sshll.u32 %s1643_s29, 4  ;;  %s1689_s11 = int_to_ptr.vmem [resolvable:$true] %s961_s11 }
  0x21   : > { %1271 = vmatprep.subr.mxu0 %v506_v4  ;;  %1317 = vmatpush3.msra.mxu1 %v505_v21  ;;  %s1367_s16 = scalar_lea.vmem %s1689_s11, 1024  ;;  %p1374_p0 = scmp.lt.s32.totalorder %s1689_s11, %s1372_s18 }
  0x22   : > { %1272 = vmatpush3.msra.mxu0 %v506_v4  ;;  %1310 = vmatprep.subr.mxu1 %v504_v22  ;;  %p1368_p11 = scmp.ne.s32.totalorder %s1689_s11, %s1367_s16  ;;  %p1375_p1 = scmp.lt.s32.totalorder %s1373_s19, %s1367_s16 }
  0x23   : > { %1248 = vmatmul.mubr.msk.f32.gmra.mxu0 %vm288_vm1, %v269_v10  ;;  %1273 = vmatprep.subr.mxu0 %v505_v21  ;;  %v1633_v10 = vld [vmem:[%s1769_s4] ss:$0 sm:$0xff] }
  0x24   : > { %1250 = vmatprep.mubr.msk.f32.mxu0 %vm288_vm1, %v270_v11  ;;  %1274 = vmatpush3.msra.mxu0 %v505_v21  ;;  %p1369_p12 = pnand %p1368_p11, %p1536_p5  ;;  %p1376_p2 = por %p1375_p1, %p1374_p0 }
  0x25   : > { %1275 = vmatprep.subr.mxu0 %v504_v22  ;;  %1318 = vmatpush3.msra.mxu1 %v504_v22 }
  0x26   : > { %1276 = vmatpush3.msra.mxu0 %v504_v22  ;;  %1311 = vmatprep.subr.mxu1 %v503_v23  ;;  %p1370_p13 = pneg %p1369_p12 }
  0x27   : > { %1251 = vmatmul.mubr.msk.f32.gmra.mxu0 %vm288_vm1, %v271_v12  ;;  %1277 = vmatprep.subr.mxu0 %v503_v23 }
  0x28   : > { %1253 = vmatprep.mubr.msk.f32.mxu0 %vm288_vm1, %v272_v13  ;;  %1278 = vmatpush3.msra.mxu0 %v503_v23  ;;  %p1377_p3 = pnand %p1376_p2, %p1370_p13 }
  0x29   : > { %1319 = vmatpush3.msra.mxu1 %v503_v23  ;;  %1279 = vmatprep.subr.mxu0 %v502_v24 }
  0x2a   : > { %1312 = vmatprep.subr.mxu1 %v502_v24  ;;  %1280 = vmatpush3.msra.mxu0 %v502_v24 }
  0x2b   : > { %1254 = vmatmul.mubr.msk.f32.gmra.mxu0 %vm288_vm1, %v273_v14  ;;  %1320 = vmatpush3.msra.mxu1 %v502_v24 }
  0x2c   : > { %1256 = vmatprep.mubr.msk.f32.mxu0 %vm288_vm1, %v274_v15 }
  0x2f   : > { %1257 = vmatmul.mubr.msk.f32.gmra.mxu0 %vm288_vm1, %v275_v16 }
  0x30   : > { %1259 = vmatprep.mubr.msk.f32.mxu0 %vm288_vm1, %v276_v17 }
  0x33   : > { %1260 = vmatmul.mubr.msk.f32.gmra.mxu0 %vm288_vm1, %v277_v18 }
  0x34   : > { %1262 = vmatprep.mubr.msk.f32.mxu0 %vm288_vm1, %v278_v19 }
  0x37   : > { %1263 = vmatmul.mubr.msk.f32.gmra.mxu0 %vm288_vm1, %v279_v20 }
  0xda   : > { %v1243_v26 = vpop.f32.mrf.mxu0 }
  0xdb   : > { %v413_v27 = vadd.f32 %v1243_v26, %v1076_v25 }
  0xdc   : > { %v407_v28 = vpop.f32.mrf.mxu0 }
  0xdd   : > { %v408_v29 = vadd.f32 %v1076_v25, %v407_v28  ;;  %v487_v32 = vmax.f32 %v413_v27, 0.0 }
  0xdf   : > { %v1246_v30 = vpop.f32.mrf.mxu0  ;;  %v486_v31 = vmax.f32 %v408_v29, 0.0 }
  0xe0   : > { %v423_v33 = vadd.f32 %v1246_v30, %v1076_v25 }
  0xe1   : > { %v417_v34 = vpop.f32.mrf.mxu0  ;;  %1281 = vmatprep.mubr.msk.f32.mxu0 %vm517_vm2, %v486_v31 }
  0xe2   : > { %v418_v35 = vadd.f32 %v1076_v25, %v417_v34  ;;  %1282 = vmatmul.mubr.msk.f32.vlgmr.msra.gmra.mxu0 %vm517_vm2, %v487_v32  ;;  %v489_v38 = vmax.f32 %v423_v33, 0.0 }
  0xe3   : > { %v1249_v36 = vpop.f32.mrf.mxu0 }
  0xe4   : > { %v488_v37 = vmax.f32 %v418_v35, 0.0  ;;  %v433_v39 = vadd.f32 %v1249_v36, %v1076_v25 }
  0xe5   : > { %v427_v40 = vpop.f32.mrf.mxu0 }
  0xe6   : > { %v428_v41 = vadd.f32 %v1076_v25, %v427_v40  ;;  %1284 = vmatprep.mubr.msk.f32.mxu1 %vm517_vm2, %v488_v37  ;;  %v491_v44 = vmax.f32 %v433_v39, 0.0 }
  0xe7   : > { %v1252_v42 = vpop.f32.mrf.mxu0  ;;  %1285 = vmatmul.mubr.msk.f32.vlgmr.msra.gmra.mxu1 %vm517_vm2, %v489_v38 }
  0xe8   : > { %v490_v43 = vmax.f32 %v428_v41, 0.0  ;;  %v443_v45 = vadd.f32 %v1252_v42, %v1076_v25 }
  0xe9   : > { %v437_v46 = vpop.f32.mrf.mxu0 }
  0xea   : > { %v438_v47 = vadd.f32 %v1076_v25, %v437_v46  ;;  %1287 = vmatprep.mubr.msk.f32.mxu1 %vm517_vm2, %v490_v43  ;;  %v493_v50 = vmax.f32 %v443_v45, 0.0 }
  0xeb   : > { %v1255_v48 = vpop.f32.mrf.mxu0  ;;  %1288 = vmatmul.mubr.msk.f32.gmra.mxu1 %vm517_vm2, %v491_v44 }
  0xec   : > { %v492_v49 = vmax.f32 %v438_v47, 0.0  ;;  %v453_v51 = vadd.f32 %v1255_v48, %v1076_v25 }
  0xed   : > { %v447_v52 = vpop.f32.mrf.mxu0 }
  0xee   : > { %v448_v53 = vadd.f32 %v1076_v25, %v447_v52  ;;  %1290 = vmatprep.mubr.msk.f32.mxu1 %vm517_vm2, %v492_v49  ;;  %v495_v56 = vmax.f32 %v453_v51, 0.0 }
  0xef   : > { %v1258_v54 = vpop.f32.mrf.mxu0  ;;  %1291 = vmatmul.mubr.msk.f32.gmra.mxu1 %vm517_vm2, %v493_v50 }
  0xf0   : > { %v494_v55 = vmax.f32 %v448_v53, 0.0  ;;  %v463_v57 = vadd.f32 %v1258_v54, %v1076_v25 }
  0xf1   : > { %v457_v58 = vpop.f32.mrf.mxu0 }
  0xf2   : > { %v458_v59 = vadd.f32 %v1076_v25, %v457_v58  ;;  %1293 = vmatprep.mubr.msk.f32.mxu1 %vm517_vm2, %v494_v55  ;;  %v497_v62 = vmax.f32 %v463_v57, 0.0 }
  0xf3   : > { %v1261_v60 = vpop.f32.mrf.mxu0  ;;  %1294 = vmatmul.mubr.msk.f32.gmra.mxu1 %vm517_vm2, %v495_v56 }
  0xf4   : > { %v496_v61 = vmax.f32 %v458_v59, 0.0  ;;  %v473_v63 = vadd.f32 %v1261_v60, %v1076_v25 }
  0xf5   : > { %v467_v0 = vpop.f32.mrf.mxu0 }
  0xf6   : > { %v468_v1 = vadd.f32 %v1076_v25, %v467_v0  ;;  %1296 = vmatprep.mubr.msk.f32.mxu1 %vm517_vm2, %v496_v61  ;;  %v499_v4 = vmax.f32 %v473_v63, 0.0 }
  0xf7   : > { %v1264_v2 = vpop.f32.mrf.mxu0  ;;  %1297 = vmatmul.mubr.msk.f32.gmra.mxu1 %vm517_vm2, %v497_v62 }
  0xf8   : > { %v498_v3 = vmax.f32 %v468_v1, 0.0  ;;  %v483_v5 = vadd.f32 %v1264_v2, %v1076_v25 }
  0xf9   : > { %v477_v6 = vpop.f32.mrf.mxu0 }
  0xfa   : > { %v478_v7 = vadd.f32 %v1076_v25, %v477_v6  ;;  %1299 = vmatprep.mubr.msk.f32.mxu1 %vm517_vm2, %v498_v3  ;;  %v501_v9 = vmax.f32 %v483_v5, 0.0 }
  0xfb   : > { %1300 = vmatmul.mubr.msk.f32.gmra.mxu1 %vm517_vm2, %v499_v4 }
  0xfc   : > { %v500_v8 = vmax.f32 %v478_v7, 0.0 }
  0xfe   : > { %1302 = vmatprep.mubr.msk.f32.mxu1 %vm517_vm2, %v500_v8 }
  0xff   : > { %1303 = vmatmul.mubr.msk.f32.gmra.mxu1 %vm517_vm2, %v501_v9 }
 0x1a2   : > { %v1283_v11 = vpop.f32.mrf.mxu0 }
 0x1a3   : > { %v638_v12 = vadd.f32 %v1283_v11, %v1633_v10 }
 0x1a4   : > { %v632_v13 = vpop.f32.mrf.mxu0 }
 0x1a5   : > { %v633_v14 = vadd.f32 %v1633_v10, %v632_v13  ;;  %v712_v16 = vmax.f32 %v638_v12, 0.0 }
 0x1a7   : > { %v1286_v15 = vpop.f32.mrf.mxu1  ;;  %v711_v17 = vmax.f32 %v633_v14, 0.0 }
 0x1a8   : > { %v648_v18 = vadd.f32 %v1286_v15, %v1633_v10 }
 0x1a9   : > { %v642_v19 = vpop.f32.mrf.mxu1  ;;  %v1154_v20 = vpack.c.bf16 %v712_v16, %v711_v17  ;;  %v807_v21 = vadd.f32 %v712_v16, %v711_v17 }
 0x1aa   : > { %v643_v22 = vadd.f32 %v1633_v10, %v642_v19  ;;  %v714_v25 = vmax.f32 %v648_v18, 0.0 }
 0x1ab   : > { %v1289_v23 = vpop.f32.mrf.mxu1  ;;  %1155 = vst [vmem:[%s1643_s29] sm:$0xff] %v1154_v20   ;;  %v808_v24 = vrot.slane %v807_v21, 4 }
 0x1ac   : > { %v713_v26 = vmax.f32 %v643_v22, 0.0  ;;  %v658_v27 = vadd.f32 %v1289_v23, %v1633_v10 }
 0x1ad   : > { %v652_v28 = vpop.f32.mrf.mxu1  ;;  %v809_v29 = vadd.f32 %v808_v24, %v807_v21 }
 0x1ae   : > { %v1159_v30 = vpack.c.bf16 %v714_v25, %v713_v26  ;;  %v814_v31 = vadd.f32 %v714_v25, %v713_v26  ;;  %v653_v32 = vadd.f32 %v1633_v10, %v652_v28  ;;  %v716_v37 = vmax.f32 %v658_v27, 0.0 }
 0x1af   : > { %v1292_v33 = vpop.f32.mrf.mxu1  ;;  %v810_v36 = vrot.slane %v809_v29, 2 }
 0x1b0   : > { %1191 = vst [vmem:[%s1643_s29 + $0x8] sm:$0xff] %v1159_v30   ;;  %v815_v34 = vrot.slane %v814_v31, 4  ;;  %v668_v35 = vadd.f32 %v1292_v33, %v1633_v10  ;;  %v715_v38 = vmax.f32 %v653_v32, 0.0 }
 0x1b1   : > { %v662_v39 = vpop.f32.mrf.mxu1  ;;  %v811_v42 = vadd.f32 %v810_v36, %v809_v29 }
 0x1b2   : > { %v816_v40 = vadd.f32 %v815_v34, %v814_v31  ;;  %v663_v41 = vadd.f32 %v1633_v10, %v662_v39  ;;  %v1164_v43 = vpack.c.bf16 %v716_v37, %v715_v38  ;;  %v821_v44 = vadd.f32 %v716_v37, %v715_v38 }
 0x1b3   : > { %v718_v45 = vmax.f32 %v668_v35, 0.0  ;;  %v1295_v46 = vpop.f32.mrf.mxu1  ;;  %v812_v49 = vrot.slane %v811_v42, 1 }
 0x1b4   : > { %v717_v47 = vmax.f32 %v663_v41, 0.0  ;;  %v678_v48 = vadd.f32 %v1295_v46, %v1633_v10  ;;  %v817_v50 = vrot.slane %v816_v40, 2  ;;  %1192 = vst [vmem:[%s1643_s29 + $0x10] sm:$0xff] %v1164_v43   ;;  %v822_v51 = vrot.slane %v821_v44, 4 }
 0x1b5   : > { %v672_v52 = vpop.f32.mrf.mxu1  ;;  %v1654_v58 = vadd.f32 %v812_v49, %v811_v42 }
 0x1b6   : > { %v1169_v53 = vpack.c.bf16 %v718_v45, %v717_v47  ;;  %v828_v54 = vadd.f32 %v718_v45, %v717_v47  ;;  %v673_v55 = vadd.f32 %v1633_v10, %v672_v52  ;;  %v823_v56 = vadd.f32 %v822_v51, %v821_v44 }
 0x1b7   : > { %v1298_v57 = vpop.f32.mrf.mxu1  ;;  %v818_v59 = vadd.f32 %v817_v50, %v816_v40  ;;  %v720_v61 = vmax.f32 %v678_v48, 0.0  ;;  %871 = vrot.lane.b32.xlu1 %v1654_v58, %s1459_s9 }
 0x1b8   : > { %1193 = vst [vmem:[%s1643_s29 + $0x18] sm:$0xff] %v1169_v53   ;;  %v829_v60 = vrot.slane %v828_v54, 4  ;;  %v719_v62 = vmax.f32 %v673_v55, 0.0  ;;  %v824_v63 = vrot.slane %v823_v56, 2  ;;  %v688_v0 = vadd.f32 %v1298_v57, %v1633_v10 }
 0x1b9   : > { %v682_v1 = vpop.f32.mrf.mxu1  ;;  %v819_v2 = vrot.slane %v818_v59, 1 }
 0x1ba   : > { %v830_v3 = vadd.f32 %v829_v60, %v828_v54  ;;  %v1174_v4 = vpack.c.bf16 %v720_v61, %v719_v62  ;;  %v835_v5 = vadd.f32 %v720_v61, %v719_v62  ;;  %v683_v6 = vadd.f32 %v1633_v10, %v682_v1 }
 0x1bb   : > { %v1301_v7 = vpop.f32.mrf.mxu1  ;;  %v1661_v8 = vadd.f32 %v819_v2, %v818_v59  ;;  %v825_v9 = vadd.f32 %v824_v63, %v823_v56  ;;  %v722_v14 = vmax.f32 %v688_v0, 0.0 }
 0x1bc   : > { %v831_v11 = vrot.slane %v830_v3, 2  ;;  %1194 = vst [vmem:[%s1643_s29 + $0x20] sm:$0xff] %v1174_v4   ;;  %v836_v12 = vrot.slane %v835_v5, 4  ;;  %v698_v13 = vadd.f32 %v1301_v7, %v1633_v10  ;;  %v721_v15 = vmax.f32 %v683_v6, 0.0 }
 0x1bd   : > { %873 = vrot.lane.b32.xlu0 %v1661_v8, %s1459_s9  ;;  %v692_v16 = vpop.f32.mrf.mxu1  ;;  %v826_v17 = vrot.slane %v825_v9, 1 }
 0x1be   : > { %v837_v18 = vadd.f32 %v836_v12, %v835_v5  ;;  %v693_v19 = vadd.f32 %v1633_v10, %v692_v16  ;;  %v832_v20 = vadd.f32 %v831_v11, %v830_v3  ;;  %v1179_v21 = vpack.c.bf16 %v722_v14, %v721_v15 }
 0x1bf   : > { %v842_v22 = vadd.f32 %v722_v14, %v721_v15  ;;  %v724_v23 = vmax.f32 %v698_v13, 0.0  ;;  %v1304_v24 = vpop.f32.mrf.mxu1  ;;  %v1668_v25 = vadd.f32 %v826_v17, %v825_v9 }
 0x1c0   : > { %v838_v26 = vrot.slane %v837_v18, 2  ;;  %v723_v27 = vmax.f32 %v693_v19, 0.0  ;;  %v708_v28 = vadd.f32 %v1304_v24, %v1633_v10  ;;  %v833_v29 = vrot.slane %v832_v20, 1  ;;  %1195 = vst [vmem:[%s1643_s29 + $0x28] sm:$0xff] %v1179_v21  }
 0x1c1   : > { %v843_v30 = vrot.slane %v842_v22, 4  ;;  %875 = vrot.lane.b32.xlu0 %v1668_v25, %s1459_s9  ;;  %v702_v31 = vpop.f32.mrf.mxu1 }
 0x1c2   : > { %v1184_v32 = vpack.c.bf16 %v724_v23, %v723_v27  ;;  %v849_v33 = vadd.f32 %v724_v23, %v723_v27  ;;  %v703_v34 = vadd.f32 %v1633_v10, %v702_v31  ;;  %v1675_v36 = vadd.f32 %v833_v29, %v832_v20 }
 0x1c3   : > { %v844_v35 = vadd.f32 %v843_v30, %v842_v22  ;;  %v839_v37 = vadd.f32 %v838_v26, %v837_v18  ;;  %v726_v39 = vmax.f32 %v708_v28, 0.0 }
 0x1c4   : > { %1196 = vst [vmem:[%s1643_s29 + $0x30] sm:$0xff] %v1184_v32   ;;  %v850_v38 = vrot.slane %v849_v33, 4  ;;  %v725_v40 = vmax.f32 %v703_v34, 0.0  ;;  %877 = vrot.lane.b32.xlu1 %v1675_v36, %s1459_s9 }
 0x1c5   : > { %v845_v41 = vrot.slane %v844_v35, 2  ;;  %v840_v42 = vrot.slane %v839_v37, 1 }
 0x1c6   : > { %v851_v43 = vadd.f32 %v850_v38, %v849_v33  ;;  %v1189_v44 = vpack.c.bf16 %v726_v39, %v725_v40  ;;  %v856_v45 = vadd.f32 %v726_v39, %v725_v40 }
 0x1c7   : > { %v841_v10 = vadd.f32 %v840_v42, %v839_v37  ;;  %v846_v46 = vadd.f32 %v845_v41, %v844_v35 }
 0x1c8   : > { %v852_v47 = vrot.slane %v851_v43, 2  ;;  %1197 = vst [vmem:[%s1643_s29 + $0x38] sm:$0xff] %v1189_v44   ;;  %v857_v48 = vrot.slane %v856_v45, 4 }
 0x1c9   : > { %879 = vrot.lane.b32.xlu0 %v841_v10, %s1459_s9  ;;  %v847_v49 = vrot.slane %v846_v46, 1 }
 0x1ca   : > { %v858_v50 = vadd.f32 %v857_v48, %v856_v45  ;;  %v853_v51 = vadd.f32 %v852_v47, %v851_v43 }
 0x1cb   : > { %v848_v52 = vadd.f32 %v847_v49, %v846_v46 }
 0x1cc   : > { %v859_v53 = vrot.slane %v858_v50, 2  ;;  %v854_v54 = vrot.slane %v853_v51, 1 }
 0x1cd   : > { %881 = vrot.lane.b32.xlu1 %v848_v52, %s1459_s9 }
 0x1ce   : > { %v855_v55 = vadd.f32 %v854_v54, %v853_v51  ;;  %v860_v56 = vadd.f32 %v859_v53, %v858_v50 }
 0x1cf   : > { %1380 = shalt.err (!%p1377_p3)
}
 0x1d0   : > { %s1381_s20 = scalar_lea.hbm %s1687_s14, 1024  ;;  %s1385_s10 = scalar_lea.hbm %s1770_s5, 2048 }
 0x1d1   : > { %p1382_p4 = scmp.ne.s32.totalorder %s1687_s14, %s1381_s20  ;;  %p1386_p9 = scmp.lt.s32.totalorder %s1687_s14, %s1770_s5 }
 0x1d2   : > { %p1387_p10 = scmp.lt.s32.totalorder %s1385_s10, %s1381_s20 }
 0x1d3   : > { %p1383_p7 = pnand %p1382_p4, %p1536_p5 }
 0x1d4   : > { %p1388_p11 = por %p1387_p10, %p1386_p9 }
 0x1d5   : > { %p1384_p8 = pneg %p1383_p7 }
 0x1d7   : > { %p1389_p12 = pnand %p1388_p11, %p1384_p8 }
 0x1d9   : > { %1392 = shalt.err (!%p1389_p12)
}
 0x1da   : > { %s1461_s16 = smov 4   ;;  %883 = vrot.lane.b32.xlu0 %v855_v55, %s1459_s9  ;;  %v861_v57 = vrot.slane %v860_v56, 1  ;;  %vm920_vm3 = vcmask 1041409   ;;  %vm923_vm4 = vcmask 1042434   ;;  %vm926_vm5 = vcmask 1043459   ;;  %s948_s20 = scalar_lea.sflag [#allocation5], %s1636_s26 }
 0x1db   : > { %1321 = dma.vmem_to_hbm [thread:$0]  (%p1536_p5), %s1689_s11, 1024, %s1687_s14, %s943_s15, %s1459_s9, %s1459_s9, %s1461_s16   ;;  %vm929_vm6 = vcmask 1044484   ;;  %vm932_vm7 = vcmask 1045509   ;;  %vm935_vm8 = vcmask 1046534   ;;  %vm938_vm9 = vcmask 1047559  }
 0x1dc   : > { %v862_v59 = vadd.f32 %v861_v57, %v860_v56  ;;  %s1131_s11 = sshll.u32 %s1519_s25, 7  ;;  %s1462_s25 = smov [#allocation4]  }
 0x1dd   : > { %s1728_s19 = scalar_lea.hbm %s1771_s6, %s1131_s11  ;;  %s1397_s29 = sshll.u32 %s1462_s25, 4  ;;  %s1398_s29 = int_to_ptr.vmem [resolvable:$false] %s1397_s29 }
 0x1de   : > { %885 = vrot.lane.b32.xlu1 %v862_v59, %s1459_s9  ;;  %s1073_s9 = sshll.u32 %s1636_s26, 3  ;;  %s1399_s10 = scalar_lea.vmem %s1398_s29, 256 }
 0x1df   : > { %s256_s14 = scalar_lea.vmem [#allocation4], %s1073_s9 }
 0x1e0   : > { %s977_s15 = sshll.u32 %s256_s14, 4  ;;  %s978_s15 = int_to_ptr.vmem [resolvable:$true] %s977_s15 }
 0x1e1   : > { %s1393_s28 = scalar_lea.vmem %s978_s15, 128  ;;  %p1400_p2 = scmp.lt.s32.totalorder %s978_s15, %s1398_s29 }
 0x1e2   : > { %p1394_p13 = scmp.ne.s32.totalorder %s978_s15, %s1393_s28  ;;  %p1401_p3 = scmp.lt.s32.totalorder %s1399_s10, %s1393_s28 }
 0x1e4   : > { %p1395_p0 = pnand %p1394_p13, %p1536_p5  ;;  %p1402_p4 = por %p1401_p3, %p1400_p2 }
 0x1e6   : > { %p1396_p1 = pneg %p1395_p0 }
 0x1e8   : > { %p1403_p7 = pnand %p1402_p4, %p1396_p1 }
 0x229   : > { %v872_v61 = vpop.permute.xlu1 %871 }
 0x22a   : > { %v895_v11 = vadd.f32 %v872_v61, %v1654_v58 }
 0x22c   : > { %v903_v18 = vmul.f32 0.03125, %v895_v11 }
 0x22f   : > { %v874_v60 = vpop.permute.xlu0 %873 }
 0x230   : > { %v896_v0 = vadd.f32 %v874_v60, %v1661_v8 }
 0x232   : > { %v904_v5 = vmul.f32 0.03125, %v896_v0 }
 0x233   : > { %v876_v62 = vpop.permute.xlu0 %875 }
 0x234   : > { %v897_v2 = vadd.f32 %v876_v62, %v1668_v25  ;;  %v919_v15 = vrot.slane %v904_v5, 7 }
 0x236   : > { %v878_v63 = vpop.permute.xlu1 %877  ;;  %v905_v7 = vmul.f32 0.03125, %v897_v2  ;;  %v921_v23 = vsel %vm920_vm3, %v919_v15, %v903_v18 }
 0x237   : > { %v898_v3 = vadd.f32 %v878_v63, %v1675_v36 }
 0x238   : > { %v922_v8 = vrot.slane %v905_v7, 6 }
 0x239   : > { %v906_v12 = vmul.f32 0.03125, %v898_v3 }
 0x23a   : > { %v924_v25 = vsel %vm923_vm4, %v922_v8, %v921_v23 }
 0x23b   : > { %v880_v1 = vpop.permute.xlu0 %879  ;;  %v925_v19 = vrot.slane %v906_v12, 5 }
 0x23c   : > { %v899_v4 = vadd.f32 %v880_v1, %v841_v10 }
 0x23d   : > { %v927_v27 = vsel %vm926_vm5, %v925_v19, %v924_v25 }
 0x23e   : > { %v907_v13 = vmul.f32 0.03125, %v899_v4 }
 0x23f   : > { %v882_v6 = vpop.permute.xlu1 %881 }
 0x240   : > { %v900_v9 = vadd.f32 %v882_v6, %v848_v52  ;;  %v928_v21 = vrot.slane %v907_v13, 4 }
 0x242   : > { %v908_v16 = vmul.f32 0.03125, %v900_v9  ;;  %v930_v29 = vsel %vm929_vm6, %v928_v21, %v927_v27 }
 0x244   : > { %v931_v58 = vrot.slane %v908_v16, 3 }
 0x246   : > { %v933_v30 = vsel %vm932_vm7, %v931_v58, %v930_v29 }
 0x24c   : > { %v884_v14 = vpop.permute.xlu0 %883 }
 0x24d   : > { %v901_v17 = vadd.f32 %v884_v14, %v855_v55 }
 0x24f   : > { %v909_v20 = vmul.f32 0.03125, %v901_v17 }
 0x250   : > { %v886_v22 = vpop.permute.xlu1 %885 }
 0x251   : > { %v902_v24 = vadd.f32 %v886_v22, %v862_v59  ;;  %v934_v26 = vrot.slane %v909_v20, 2 }
 0x253   : > { %v910_v28 = vmul.f32 0.03125, %v902_v24  ;;  %v936_v32 = vsel %vm935_vm8, %v934_v26, %v933_v30 }
 0x255   : > { %v937_v31 = vrot.slane %v910_v28, 1 }
 0x257   : > { %v939_v33 = vsel %vm938_vm9, %v937_v31, %v936_v32 }
 0x258   : > { %941 = vst.msk [vmem:[%s256_s14] sm:$0xff] %vm517_vm2, %v939_v33 }
 0x259   : > { %1406 = shalt.err (!%p1403_p7)
}
 0x25a   : > { %s1407_s12 = scalar_lea.hbm %s1728_s19, 128  ;;  %s1411_s16 = scalar_lea.hbm %s1771_s6, 256 }
 0x25b   : > { %p1408_p8 = scmp.ne.s32.totalorder %s1728_s19, %s1407_s12  ;;  %p1412_p11 = scmp.lt.s32.totalorder %s1728_s19, %s1771_s6 }
 0x25c   : > { %p1413_p12 = scmp.lt.s32.totalorder %s1411_s16, %s1407_s12 }
 0x25d   : > { %p1409_p9 = pnand %p1408_p8, %p1536_p5 }
 0x25e   : > { %p1414_p13 = por %p1413_p12, %p1412_p11 }
 0x25f   : > { %p1410_p10 = pneg %p1409_p9 }
 0x261   : > { %p1415_p0 = pnand %p1414_p13, %p1410_p10 }
 0x263   : > { %1418 = shalt.err (!%p1415_p0)
}
 0x264   : > { %1322 = dma.vmem_to_hbm [thread:$0]  (%p1536_p5), %s978_s15, 128, %s1728_s19, %s948_s20  }
 0x265 PF: > { %p1332_p1 = scmp.ge.s32.totalorder %s1457_s24, 2  ;;  %s989_s14 = sand.u32 1, %s1445_s21  }
 0x266   : > { %s990_s17 = scalar_lea.sflag [#allocation3], %s989_s14 }
 0x267   : > { %p1326_p2 = pnand %p1332_p1, %p1540_p6 }
 0x269   : > { %p1327_p3 = pneg %p1326_p2 }
 0x26b   : > { %1436 = dma.done.wait (%p1327_p3), %s990_s17, 1024  }
 0x26c   : > { %1438 = vsyncadd (%p1327_p3), %s990_s17, 4294966272  ;;  %s999_s18 = scalar_lea.sflag [#allocation5], %s989_s14 }
 0x26d   : > { %1440 = dma.done.wait (%p1327_p3), %s999_s18, 128  }
 0x26e   : > { %1442 = vsyncadd (%p1327_p3), %s999_s18, 4294967168  ;;  %p20_p5 = scmp.ge.s32.totalorder %s1523_s27, 4   ;;  %s1774_s21 = smov %s1449_s22 }
 0x26f   : > { %s1775_s22 = smov %s1453_s23  ;;  %s1776_s23 = smov %s1534_s30 }
 0x270   : > { %s1777_s24 = smov %s1523_s27  ;;  %22 = sbr.rel (!%p20_p5) target bundleno = 5 (0x5), region = 92 }
 0x275   :  { %1004 = vsyncpa [#allocation3], 1 }
 0x276   :  { %1006 = vsyncpa [#allocation3 + $0x1], 1 }
 0x277   :  { %1007 = vsyncpa [#allocation5], 1 }
 0x278   :  { %1009 = vsyncpa [#allocation5 + $0x1], 1 }

</bundles_post_ra>
